<compile_context>
chip_gen: v5e
topology: v5e:2x2
jax: 0.10.0
libtpu: 0.0.40
codegen_flags: <defaults>
</compile_context>

<pallas_src>
import functools

import jax
import jax.numpy as jnp
from jax.experimental import pallas as pl
from jax.experimental.pallas import tpu as pltpu

_EPS = 1e-5
_TARGET_BLOCK_BYTES = 2 << 20   # ~2 MiB input blocks: >=85% of HBM roofline measured
_F32_TEMP_TILES = 3             # in-kernel f32 working set (cast copy, x*x, xhat)


def _round_up(x, m):
    return -(-x // m) * m


def _vmem_plan():
    """Return (vmem_limit_bytes, block-footprint budget) sized per generation."""
    capacity = 64 << 20          # conservative fallback == v7x (64 MiB / TC)
    try:
        info = pltpu.get_tpu_info()
        cap = getattr(info, "vmem_capacity_bytes", None)
        if cap:
            capacity = int(cap)
    except Exception:
        pass
    # 48 MiB on v7x, 96 MiB on v5e/v6e; always explicit (default scoped limit is
    # only ~16 MiB on v5e / ~32 MiB on v6e/v7x).
    vmem_limit = int(min(capacity * 3 // 4, 96 << 20))
    # Budget for 2x(in)+2x(out) double-buffered blocks + f32 temporaries, with
    # headroom left under the limit.
    budget = int(max(12 << 20, min(vmem_limit - (8 << 20), 40 << 20)))
    return vmem_limit, budget


# ---------------------------------------------------------------------------
# 4-D (NCHW) path: x viewed as (b, c, h*w); reduce over channels (sublanes),
# tile over (a few) batch images and the lane-dense h*w axis.
# ---------------------------------------------------------------------------

def _ln_chw_kernel_withbias(x_ref, w_ref, b_ref, o_ref, *, eps: float):
    x = x_ref[...].astype(jnp.float32)                 # (kb, C, thw)
    w = w_ref[...].astype(jnp.float32)                 # (C, 1)
    b = b_ref[...].astype(jnp.float32)                 # (C, 1)
    mu = jnp.mean(x, axis=1, keepdims=True)            # (kb, 1, thw)
    m2 = jnp.mean(x * x, axis=1, keepdims=True)
    var = jnp.maximum(m2 - mu * mu, 0.0)               # one-pass var, f32 accum
    inv = jax.lax.rsqrt(var + eps)                     # EUP slot (free)
    o_ref[...] = ((x - mu) * inv * w + b).astype(o_ref.dtype)


def _ln_chw_kernel_biasfree(x_ref, w_ref, o_ref, *, eps: float):
    x = x_ref[...].astype(jnp.float32)                 # (kb, C, thw)
    w = w_ref[...].astype(jnp.float32)                 # (C, 1)
    mu = jnp.mean(x, axis=1, keepdims=True)
    m2 = jnp.mean(x * x, axis=1, keepdims=True)
    var = jnp.maximum(m2 - mu * mu, 0.0)
    inv = jax.lax.rsqrt(var + eps)
    # BiasFree: normalize x itself (mean only enters through the variance).
    o_ref[...] = (x * inv * w).astype(o_ref.dtype)


def _plan_nchw_tiles(b, c, hw, itemsize, budget):
    """Pick (kb, tile_hw): batch-images-per-step and lane tile."""
    # Bytes each lane column of a block costs: double-buffered in + out blocks
    # plus ~_F32_TEMP_TILES full-tile f32 temporaries inside the kernel.
    per_lane_fp = c * (4 * itemsize + _F32_TEMP_TILES * 4)
    per_lane_blk = c * itemsize
    tile_hw = min(budget // per_lane_fp, _TARGET_BLOCK_BYTES // per_lane_blk)
    tile_hw = max(128, (tile_hw // 128) * 128)

    if hw > tile_hw:
        # Lane-tiled: grid along hw already has >= 2 steps.
        return 1, tile_hw

    # One lane tile covers the whole image -> batch several images per step to
    # keep blocks near the target size and amortize the ~0.35us/step overhead.
    tile_hw = hw
    per_img_blk = hw * c * itemsize
    per_img_fp = hw * per_lane_fp
    kb = max(1, min(_TARGET_BLOCK_BYTES // per_img_blk, budget // per_img_fp))
    kb = min(kb, b)
    if b >= 2 and kb >= b:
        kb = _round_up(b, 2) // 2                      # keep >= 2 grid steps (dual-TC)
    if b == 1 and hw > 128:
        tile_hw = min(hw, _round_up(-(-hw // 2), 128))  # split hw for 2 steps instead
    return kb, tile_hw


def _layernorm_nchw(x, weight, bias, *, with_bias: bool, eps: float = _EPS):
    b, c, h, w = x.shape
    hw = h * w
    x3 = x.reshape(b, c, hw)                  # contiguous view, no transpose
    vmem_limit, budget = _vmem_plan()
    kb, tile_hw = _plan_nchw_tiles(b, c, hw, x.dtype.itemsize, budget)
    grid = (pl.cdiv(b, kb), pl.cdiv(hw, tile_hw))

    x_spec = pl.BlockSpec((kb, c, tile_hw), lambda i, j: (i, 0, j))
    p_spec = pl.BlockSpec((c, 1), lambda i, j: (0, 0))
    o_spec = pl.BlockSpec((kb, c, tile_hw), lambda i, j: (i, 0, j))

    w2 = weight.reshape(c, 1)
    if with_bias:
        kernel = functools.partial(_ln_chw_kernel_withbias, eps=eps)
        in_specs = [x_spec, p_spec, p_spec]
        args = (x3, w2, bias.reshape(c, 1))
    else:
        kernel = functools.partial(_ln_chw_kernel_biasfree, eps=eps)
        in_specs = [x_spec, p_spec]
        args = (x3, w2)

    y3 = pl.pallas_call(
        kernel,
        out_shape=jax.ShapeDtypeStruct((b, c, hw), x.dtype),
        grid_spec=pltpu.PrefetchScalarGridSpec(
            num_scalar_prefetch=0,
            grid=grid,
            in_specs=in_specs,
            out_specs=o_spec,
        ),
        compiler_params=pltpu.CompilerParams(
            dimension_semantics=("parallel", "parallel"),
            vmem_limit_bytes=vmem_limit),
    )(*args)
    return y3.reshape(b, c, h, w)


# ---------------------------------------------------------------------------
# 3-D (b, L, c) path: normalize over the (already-last) channel axis; tile rows.
# TODO(synk): when c < 128 (not a multiple of 128) this path under-fills lanes
# and uses masked stores; a channels-on-sublane layout would need an extra HBM
# transpose pass, so it is left as-is and only fast for c that is a multiple
# of 128.
# ---------------------------------------------------------------------------

def _ln_rows_kernel_withbias(x_ref, w_ref, b_ref, o_ref, *, eps: float):
    x = x_ref[...].astype(jnp.float32)        # (tile_rows, C)
    w = w_ref[...].astype(jnp.float32)        # (1, C)
    b = b_ref[...].astype(jnp.float32)        # (1, C)
    mu = jnp.mean(x, axis=-1, keepdims=True)
    m2 = jnp.mean(x * x, axis=-1, keepdims=True)
    var = jnp.maximum(m2 - mu * mu, 0.0)
    inv = jax.lax.rsqrt(var + eps)
    o_ref[...] = ((x - mu) * inv * w + b).astype(o_ref.dtype)


def _ln_rows_kernel_biasfree(x_ref, w_ref, o_ref, *, eps: float):
    x = x_ref[...].astype(jnp.float32)
    w = w_ref[...].astype(jnp.float32)
    mu = jnp.mean(x, axis=-1, keepdims=True)
    m2 = jnp.mean(x * x, axis=-1, keepdims=True)
    var = jnp.maximum(m2 - mu * mu, 0.0)
    inv = jax.lax.rsqrt(var + eps)
    o_ref[...] = (x * inv * w).astype(o_ref.dtype)


def _plan_rows_tiles(n, c, itemsize, budget):
    per_row_fp = c * (4 * itemsize + _F32_TEMP_TILES * 4)
    per_row_blk = c * itemsize
    tile = min(budget // per_row_fp, max(8, _TARGET_BLOCK_BYTES // per_row_blk))
    tile = max(8, (tile // 8) * 8)
    if n > tile:
        return tile
    if n > 8:
        # Split so there are >= 2 grid steps for dual-TC sharding.
        return min(n, _round_up(-(-n // 2), 8))
    return n


def _layernorm_rows(x2, weight, bias, *, with_bias: bool, eps: float = _EPS):
    n, c = x2.shape
    vmem_limit, budget = _vmem_plan()
    tile_rows = _plan_rows_tiles(n, c, x2.dtype.itemsize, budget)
    grid = (pl.cdiv(n, tile_rows),)

    x_spec = pl.BlockSpec((tile_rows, c), lambda i: (i, 0))
    p_spec = pl.BlockSpec((1, c), lambda i: (0, 0))
    o_spec = pl.BlockSpec((tile_rows, c), lambda i: (i, 0))

    w2 = weight.reshape(1, c)
    if with_bias:
        kernel = functools.partial(_ln_rows_kernel_withbias, eps=eps)
        in_specs = [x_spec, p_spec, p_spec]
        args = (x2, w2, bias.reshape(1, c))
    else:
        kernel = functools.partial(_ln_rows_kernel_biasfree, eps=eps)
        in_specs = [x_spec, p_spec]
        args = (x2, w2)

    return pl.pallas_call(
        kernel,
        out_shape=jax.ShapeDtypeStruct((n, c), x2.dtype),
        grid_spec=pltpu.PrefetchScalarGridSpec(
            num_scalar_prefetch=0,
            grid=grid,
            in_specs=in_specs,
            out_specs=o_spec,
        ),
        compiler_params=pltpu.CompilerParams(
            dimension_semantics=("parallel",),
            vmem_limit_bytes=vmem_limit),
    )(*args)


# ---------------------------------------------------------------------------
# Module-equivalent wrapper.
# ---------------------------------------------------------------------------

def layernorm(x, weight, bias=None, *, layernorm_type: str = "WithBias"):
    """Equivalent of the PyTorch LayerNorm module's forward.

    x: NCHW (b, c, h, w) or (b, L, c); normalization over the channel axis.
    """
    with_bias = (layernorm_type != "BiasFree")
    if with_bias and bias is None:
        raise ValueError("WithBias LayerNorm requires a bias parameter")

    if x.ndim == 4:
        return _layernorm_nchw(x, weight, bias, with_bias=with_bias)
    b, L, c = x.shape
    y2 = _layernorm_rows(x.reshape(b * L, c), weight, bias, with_bias=with_bias)
    return y2.reshape(b, L, c)


if __name__ == "__main__":
    key = jax.random.PRNGKey(0)
    b, c, h, w = 2, 4, 16, 16
    x = jax.random.normal(key, (b, c, h, w), dtype=jnp.float32)

    # Deterministic params, matching nn.Parameter(torch.ones/zeros(dim)).
    weight = jnp.ones((c,), dtype=jnp.float32)
    bias = jnp.zeros((c,), dtype=jnp.float32)

    # WithBias variant (module default branch).
    y = jax.block_until_ready(layernorm(x, weight, bias, layernorm_type="WithBias"))
    # BiasFree variant.
    y_bf = jax.block_until_ready(layernorm(x, weight, bias, layernorm_type="BiasFree"))

    # Pure-JAX reference (same math as the PyTorch module, two-pass variance).
    x3 = jnp.transpose(x, (0, 2, 3, 1)).reshape(b, h * w, c)
    mu = jnp.mean(x3, axis=-1, keepdims=True)
    var = jnp.mean((x3 - mu) ** 2, axis=-1, keepdims=True)
    ref = (x3 - mu) / jnp.sqrt(var + 1e-5) * weight + bias
    ref = jnp.transpose(ref.reshape(b, h, w, c), (0, 3, 1, 2))
    assert jnp.allclose(y, ref, atol=5e-5, rtol=5e-5), "WithBias mismatch"

    ref_bf = x3 / jnp.sqrt(var + 1e-5) * weight
    ref_bf = jnp.transpose(ref_bf.reshape(b, h, w, c), (0, 3, 1, 2))
    assert jnp.allclose(y_bf, ref_bf, atol=5e-5, rtol=5e-5), "BiasFree mismatch"

    # Exercise the 3-D branch of the module once as well.
    L, c3 = 8, 32
    x3d = jax.random.normal(jax.random.PRNGKey(1), (2, L, c3), dtype=jnp.float32)
    w3 = jnp.ones((c3,), dtype=jnp.float32)
    b3 = jnp.zeros((c3,), dtype=jnp.float32)
    y3 = jax.block_until_ready(layernorm(x3d, w3, b3, layernorm_type="WithBias"))
    mu3 = jnp.mean(x3d, axis=-1, keepdims=True)
    var3 = jnp.mean((x3d - mu3) ** 2, axis=-1, keepdims=True)
    ref3 = (x3d - mu3) / jnp.sqrt(var3 + 1e-5) * w3 + b3
    assert jnp.allclose(y3, ref3, atol=5e-5, rtol=5e-5), "3D mismatch"

    print("KERNEL_OK")
</pallas_src>

<mosaic_0001>
module attributes {stable_mosaic.version = 11 : i64} {
  func.func @_ln_chw_kernel_withbias(%arg0: i32, %arg1: i32, %arg2: memref<1x4x256xf32, #tpu.memory_space<vmem>>, %arg3: memref<4x1xf32, #tpu.memory_space<vmem>>, %arg4: memref<4x1xf32, #tpu.memory_space<vmem>>, %arg5: memref<1x4x256xf32, #tpu.memory_space<vmem>>) attributes {dimension_semantics = [#tpu.dimension_semantics<parallel>, #tpu.dimension_semantics<parallel>], iteration_bounds = array<i64: 2, 1>, scalar_prefetch = 0 : i64, scratch_operands = 0 : i64, tpu.core_type = #tpu.core_type<tc>, window_params = [{transform_indices = @transform_0, window_bounds = array<i64: 1, 4, 256>}, {pipeline_mode = #tpu.pipeline_mode<synchronous>, transform_indices = @transform_1, window_bounds = array<i64: 4, 1>}, {pipeline_mode = #tpu.pipeline_mode<synchronous>, transform_indices = @transform_2, window_bounds = array<i64: 4, 1>}, {transform_indices = @transform_3, window_bounds = array<i64: 1, 4, 256>}]} {
    %c0 = arith.constant 0 : index
    %c0_0 = arith.constant 0 : index
    %c0_1 = arith.constant 0 : index
    %0 = vector.load %arg2[%c0, %c0_0, %c0_1] : memref<1x4x256xf32, #tpu.memory_space<vmem>>, vector<1x4x256xf32>
    %c0_2 = arith.constant 0 : index
    %c0_3 = arith.constant 0 : index
    %1 = vector.load %arg3[%c0_2, %c0_3] : memref<4x1xf32, #tpu.memory_space<vmem>>, vector<4x1xf32>
    %c0_4 = arith.constant 0 : index
    %c0_5 = arith.constant 0 : index
    %2 = vector.load %arg4[%c0_4, %c0_5] : memref<4x1xf32, #tpu.memory_space<vmem>>, vector<4x1xf32>
    %cst = arith.constant dense<0.000000e+00> : vector<1x256xf32>
    %3 = vector.multi_reduction <add>, %0, %cst [1] : vector<1x4x256xf32> to vector<1x256xf32>
    %4 = vector.shape_cast %3 : vector<1x256xf32> to vector<1x1x256xf32>
    %cst_6 = arith.constant 4.000000e+00 : f32
    %5 = vector.broadcast %cst_6 : f32 to vector<1x1x256xf32>
    %6 = arith.divf %4, %5 : vector<1x1x256xf32>
    %7 = arith.mulf %0, %0 : vector<1x4x256xf32>
    %cst_7 = arith.constant dense<0.000000e+00> : vector<1x256xf32>
    %8 = vector.multi_reduction <add>, %7, %cst_7 [1] : vector<1x4x256xf32> to vector<1x256xf32>
    %9 = vector.shape_cast %8 : vector<1x256xf32> to vector<1x1x256xf32>
    %cst_8 = arith.constant 4.000000e+00 : f32
    %10 = vector.broadcast %cst_8 : f32 to vector<1x1x256xf32>
    %11 = arith.divf %9, %10 : vector<1x1x256xf32>
    %12 = arith.mulf %6, %6 : vector<1x1x256xf32>
    %13 = arith.subf %11, %12 : vector<1x1x256xf32>
    %cst_9 = arith.constant 0.000000e+00 : f32
    %14 = vector.broadcast %cst_9 : f32 to vector<1x1x256xf32>
    %15 = arith.maximumf %13, %14 : vector<1x1x256xf32>
    %cst_10 = arith.constant 9.99999974E-6 : f32
    %16 = vector.broadcast %cst_10 : f32 to vector<1x1x256xf32>
    %17 = arith.addf %15, %16 : vector<1x1x256xf32>
    %18 = math.rsqrt %17 : vector<1x1x256xf32>
    %19 = vector.broadcast %6 : vector<1x1x256xf32> to vector<1x4x256xf32>
    %20 = arith.subf %0, %19 : vector<1x4x256xf32>
    %21 = vector.broadcast %18 : vector<1x1x256xf32> to vector<1x4x256xf32>
    %22 = arith.mulf %20, %21 : vector<1x4x256xf32>
    %23 = vector.shape_cast %1 : vector<4x1xf32> to vector<1x4x1xf32>
    %24 = vector.broadcast %23 : vector<1x4x1xf32> to vector<1x4x256xf32>
    %25 = arith.mulf %22, %24 : vector<1x4x256xf32>
    %26 = vector.shape_cast %2 : vector<4x1xf32> to vector<1x4x1xf32>
    %27 = vector.broadcast %26 : vector<1x4x1xf32> to vector<1x4x256xf32>
    %28 = arith.addf %25, %27 : vector<1x4x256xf32>
    %c0_11 = arith.constant 0 : index
    %c0_12 = arith.constant 0 : index
    %c0_13 = arith.constant 0 : index
    %29 = vector.load %arg5[%c0_11, %c0_12, %c0_13] : memref<1x4x256xf32, #tpu.memory_space<vmem>>, vector<1x4x256xf32>
    tpu.vector_store %arg5[%c0_11, %c0_12, %c0_13], %28 {strides = array<i32>} : memref<1x4x256xf32, #tpu.memory_space<vmem>>, vector<1x4x256xf32>,
    return
  }
  func.func @transform_0(%arg0: i32, %arg1: i32) -> (i32, i32, i32) {
    %c0_i32 = arith.constant 0 : i32
    %c0_i32_0 = arith.constant 0 : i32
    return %arg0, %c0_i32, %arg1 : i32, i32, i32
  }
  func.func @transform_1(%arg0: i32, %arg1: i32) -> (i32, i32) {
    %c0_i32 = arith.constant 0 : i32
    %c0_i32_0 = arith.constant 0 : i32
    %c0_i32_1 = arith.constant 0 : i32
    return %c0_i32, %c0_i32_0 : i32, i32
  }
  func.func @transform_2(%arg0: i32, %arg1: i32) -> (i32, i32) {
    %c0_i32 = arith.constant 0 : i32
    %c0_i32_0 = arith.constant 0 : i32
    %c0_i32_1 = arith.constant 0 : i32
    return %c0_i32, %c0_i32_0 : i32, i32
  }
  func.func @transform_3(%arg0: i32, %arg1: i32) -> (i32, i32, i32) {
    %c0_i32 = arith.constant 0 : i32
    %c0_i32_0 = arith.constant 0 : i32
    return %arg0, %c0_i32, %arg1 : i32, i32, i32
  }
}

</mosaic_0001>

<bundles_post_ra>
// kernel: tpu_custom_call.1
= control target key start
LH: loop header
LB: loop body
LE: loop exit
PB: predicated region body
PF: predicated region fallthrough
CT: control target
= control target key end

     0   :  { %8 = vsyncpa [#allocation3], 0  ;;  %s797_s0 = inlined_call_operand.hbm [shape: f32[2,4,256], index: 0, kind: input, shape index: {}]   ;;  %s798_s1 = inlined_call_operand.vmem [shape: f32[4,1], index: 1, kind: input, shape index: {}]   ;;  %s799_s2 = inlined_call_operand.vmem [shape: f32[4,1], index: 2, kind: input, shape index: {}]   ;;  %s800_s3 = inlined_call_operand.hbm [shape: f32[2,4,256], index: 3, kind: output, shape index: {}]  }
   0x1   :  { %10 = vsyncpa [#allocation3 + $0x1], 0 }
   0x2   :  { %11 = vsyncpa [#allocation4], 0 }
   0x3   :  { %13 = vsyncpa [#allocation4 + $0x1], 0  ;;  %s655_s12 = smov 0   ;;  %s657_s13 = smov 0  }
   0x4   :  { %s659_s14 = smov 0   ;;  %s661_s15 = smov 0  }
   0x5   :  { %s663_s16 = smov 0   ;;  %s665_s17 = smov 0  }
   0x6 LB: > { %s429_s18 = sadd.s32 4294967295, %s630_s17   ;;  %s430_s19 = sadd.s32 4294967294, %s630_s17   ;;  %s630_s17 = sphi %s665_s17, %s19_s17   ;;  %s626_s16 = sphi %s663_s16, %s809_s16   ;;  %s622_s15 = sphi %s661_s15, %s808_s15   ;;  %s618_s14 = sphi %s659_s14, %s807_s14   ;;  %s614_s13 = sphi %s657_s13, %s806_s13   ;;  %s610_s12 = sphi %s655_s12, %s805_s12  }
   0x7   : > { %s31_s20 = sadd.s32 1, %s626_s16  ;;  %s40_s21 = sadd.s32 1, %s618_s14 }
   0x8   : > { %p33_p0 = scmp.ge.s32.totalorder %s31_s20, 2  ;;  %p47_p1 = scmp.ne.s32.totalorder %s618_s14, %s614_s13 }
   0x9   : > { %p48_p2 = scmp.eq.s32.totalorder %s630_s17, 0  ;;  %p53_p3 = scmp.ne.s32.totalorder %s614_s13, %s610_s12 }
   0xa   : > { %s811_s20 = smov (%p33_p0, %s31_s20), 0  ;;  %p54_p5 = scmp.eq.s32.totalorder %s429_s18, 0 }
   0xb   : > { %p696_p4 = por %p48_p2, %p47_p1  ;;  %s35_s23 = ssub.s32 %s626_s16, %s811_s20 }
   0xc   : > { %p121_p6 = scmp.eq.s32.totalorder %s429_s18, 1  ;;  %p38_p7 = scmp.eq.s32.totalorder %s35_s23, 0 }
   0xd   : > { %p702_p8 = por %p54_p5, %p53_p3  ;;  %p127_p10 = scmp.eq.s32.totalorder %s430_s19, 1 }
   0xe   : > { %p706_p9 = por %p121_p6, %p47_p1  ;;  %p432_p12 = scmp.ge.s32.totalorder %s630_s17, 2 }
   0xf   : > { %s711_s26 = scalar_select %p38_p7, %s618_s14, %s40_s21  }
  0x10   : > { %p713_p11 = por %p127_p10, %p53_p3  ;;  %p458_p13 = scmp.lt.s32.totalorder %s630_s17, 2 }
  0x11   : > { %s153_s28 = sand.u32 1, %s618_s14   ;;  %s444_s30 = sshll.u32 %s626_s16, 3 }
  0x12   : > { %s433_s29 = sshll.u32 %s153_s28, 3  ;;  %s164_s6 = scalar_lea.hbm %s797_s0, %s444_s30 }
  0x13   : > { %s157_s7 = scalar_lea.vmem [#allocation2], %s433_s29  ;;  %s166_s9 = sshll.u32 %s164_s6, 4  ;;  %s167_s9 = int_to_ptr.hbm [resolvable:$true] %s166_s9 }
  0x14   : > { %s168_s8 = sshll.u32 %s157_s7, 4  ;;  %p451_p0 = pnand %p458_p13, %p696_p4  ;;  %s169_s8 = int_to_ptr.vmem [resolvable:$true] %s168_s8 }
  0x15   : > { %p436_p1 = scmp.ge.s32.totalorder %s630_s17, 1  ;;  %p173_p2 = scmp.lt.s32.totalorder %s630_s17, 3 }
  0x16   : > { %s154_s10 = scalar_lea.sflag [#allocation3], %s153_s28 }
  0x17   : > { %453 = dma.hbm_to_vmem [thread:$0]  (!%p451_p0), %s167_s9, 128, %s169_s8, %s154_s10  }
  0x18   : > { %p174_p3 = pnand %p436_p1, %p173_p2 }
  0x19   : > { %s729_s11 = sand.u32 (!%p174_p3), 1, %s614_s13  }
  0x1a   : > { %177 = sbr.rel (%p174_p3) target bundleno = 164 (0xa4), region = 32  ;;  %s437_s18 = sshll.u32 (!%p174_p3), %s729_s11, 3 }
  0x1b   : > { %s180_s19 = scalar_lea.sflag (!%p174_p3), [#allocation3], %s729_s11  ;;  %s183_s21 = scalar_lea.vmem (!%p174_p3), [#allocation2], %s437_s18 }
  0x1f   : > { %601 = dma.done.wait (%p702_p8), %s180_s19, 128  }
  0x20   : > { %603 = vsyncadd (%p702_p8), %s180_s19, 4294967168  ;;  %v632_v0 = vmov 0   ;;  %v210_v1 = vld [vmem:[%s798_s1] sm:$0xf]  ;;  %v745_v3 = vld [vmem:[%s183_s21] sm:$0xff]  ;;  %v633_v5 = vmov 4.0  }
  0x21   : > { %511 = vset.pattern.permute.xlu0 %v632_v0  ;;  %v211_v2 = vld [vmem:[%s799_s2] sm:$0xf]  ;;  %213 = vst [vmem:[#allocation1] ss:$2 sm:$0xff] %v745_v3  ;;  %v242_v4 = vmul.f32 %v745_v3, %v745_v3  ;;  %512 = vrcp.f32 %v633_v5  ;;  %vm218_vm0 = vcmask 1043456   ;;  %s445_s24 = sshll.u32 %s622_s15, 3 }
  0x22   : > { %307 = vperm.xlu0 %511, %v210_v1   ;;  %s340_s5 = scalar_lea.hbm %s800_s3, %s445_s24  ;;  %s206_s6 = scalar_lea.vmem [#allocation5], %s437_s18 }
  0x23   : > { %s342_s7 = sshll.u32 %s206_s6, 4  ;;  %s344_s8 = sshll.u32 %s340_s5, 4  ;;  %s343_s7 = int_to_ptr.vmem [resolvable:$true] %s342_s7  ;;  %s345_s8 = int_to_ptr.hbm [resolvable:$true] %s344_s8 }
  0x24   : > { %s327_s9 = scalar_lea.sflag [#allocation4], %s729_s11  ;;  %s562_s15 = sshra.s32 %s345_s8, 4  ;;  %s563_s15 = int_to_ptr.hbm [resolvable:$true] %s562_s15 }
  0x25   : > { %s564_s10 = scalar_lea.hbm %s563_s15, 8  ;;  %s568_s18 = scalar_lea.hbm %s800_s3, 16 }
  0x26   : > { %p565_p4 = scmp.ne.s32.totalorder %s563_s15, %s564_s10  ;;  %p569_p7 = scmp.lt.s32.totalorder %s563_s15, %s800_s3 }
  0x27   : > { %v513_v8 = vpop.eup %512  ;;  %p570_p8 = scmp.lt.s32.totalorder %s568_s18, %s564_s10 }
  0x28   : > { %v214_v6 = vld.sshfl [vmem:[#allocation1] sm:$0xff pattern:$0x75316420]  ;;  %v215_v7 = vld.sshfl [vmem:[#allocation1 + $0x8] sm:$0xff pattern:$0x75316420]  ;;  %vm238_vm1 = vweird.f32 %v513_v8  ;;  %p566_p5 = pnand %p565_p4, %p706_p9 }
  0x29   : > { %244 = vst [vmem:[#allocation1] ss:$2 sm:$0xff] %v242_v4  ;;  %v226_v9 = vsel %vm218_vm0, %v215_v7, 0.0  ;;  %v234_v12 = vmul.f32 4.0, %v513_v8  ;;  %v219_v13 = vsel %vm218_vm0, %v214_v6, 0.0  ;;  %p571_p10 = por %p570_p8, %p569_p7 }
  0x2a   : > { %317 = vperm.xlu0 %511, %v211_v2   ;;  %v227_v10 = vrot.slane %v226_v9, 4  ;;  %v220_v15 = vrot.slane %v219_v13, 4  ;;  %v634_v7 = vmov 839922192   ;;  %p567_p6 = pneg %p566_p5 }
  0x2b   : > { %v235_v24 = vsub.f32 1.0, %v234_v12 }
  0x2c   : > { %v228_v16 = vadd.f32 %v227_v10, %v226_v9  ;;  %v221_v20 = vadd.f32 %v220_v15, %v219_v13  ;;  %p572_p13 = pnand %p571_p10, %p567_p6 }
  0x2d   : > { %v236_v29 = vmul.f32 %v513_v8, %v235_v24 }
  0x2e   : > { %v229_v21 = vrot.slane %v228_v16, 2  ;;  %v222_v25 = vrot.slane %v221_v20, 2 }
  0x2f   : > { %v237_v34 = vadd.f32 %v513_v8, %v236_v29 }
  0x30   : > { %v246_v11 = vld.sshfl [vmem:[#allocation1 + $0x8] sm:$0xff pattern:$0x75316420]  ;;  %v245_v17 = vld.sshfl [vmem:[#allocation1] sm:$0xff pattern:$0x75316420]  ;;  %v230_v26 = vadd.f32 %v229_v21, %v228_v16  ;;  %v223_v30 = vadd.f32 %v222_v25, %v221_v20 }
  0x31   : > { %v256_v14 = vsel %vm218_vm0, %v246_v11, 0.0  ;;  %v249_v19 = vsel %vm218_vm0, %v245_v17, 0.0  ;;  %v239_v39 = vsel %vm238_vm1, %v513_v8, %v237_v34  ;;  %v310_v8 = vunpack.c.l.s4 %v634_v7 }
  0x32   : > { %v257_v18 = vrot.slane %v256_v14, 4  ;;  %v250_v22 = vrot.slane %v249_v19, 4  ;;  %v231_v31 = vrot.slane %v230_v26, 1  ;;  %v224_v35 = vrot.slane %v223_v30, 1 }
  0x33   : > { %v311_v13 = vunpack.c.0.s8 %v310_v8 }
  0x34   : > { %v258_v23 = vadd.f32 %v257_v18, %v256_v14  ;;  %v251_v27 = vadd.f32 %v250_v22, %v249_v19  ;;  %v232_v36 = vadd.f32 %v231_v31, %v230_v26  ;;  %v225_v40 = vadd.f32 %v224_v35, %v223_v30 }
  0x36   : > { %v259_v28 = vrot.slane %v258_v23, 2  ;;  %v252_v32 = vrot.slane %v251_v27, 2  ;;  %v241_v41 = vmul.f32 %v239_v39, %v232_v36  ;;  %v240_v44 = vmul.f32 %v239_v39, %v225_v40 }
  0x38   : > { %v260_v33 = vadd.f32 %v259_v28, %v258_v23  ;;  %v253_v37 = vadd.f32 %v252_v32, %v251_v27  ;;  %v266_v47 = vmul.f32 %v241_v41, %v241_v41  ;;  %v265_v49 = vmul.f32 %v240_v44, %v240_v44 }
  0x39   : > { %v295_v4 = vrot.slane %v241_v41, 4 }
  0x3a   : > { %v261_v38 = vrot.slane %v260_v33, 1  ;;  %v254_v42 = vrot.slane %v253_v37, 1 }
  0x3b   : > { %v296_v9 = vsel %vm218_vm0, %v240_v44, %v295_v4 }
  0x3c   : > { %v262_v43 = vadd.f32 %v261_v38, %v260_v33  ;;  %v255_v45 = vadd.f32 %v254_v42, %v253_v37  ;;  %v298_v14 = vsub.f32 %v745_v3, %v296_v9 }
  0x3e   : > { %v264_v46 = vmul.f32 %v262_v43, %v239_v39  ;;  %v263_v48 = vmul.f32 %v255_v45, %v239_v39 }
  0x40   : > { %v268_v50 = vsub.f32 %v264_v46, %v266_v47  ;;  %v267_v51 = vsub.f32 %v263_v48, %v265_v49 }
  0x42   : > { %v270_v52 = vmax.f32 %v268_v50, 0.0  ;;  %v269_v53 = vmax.f32 %v267_v51, 0.0 }
  0x44   : > { %v272_v54 = vadd.f32 1e-05, %v270_v52  ;;  %v271_v55 = vadd.f32 1e-05, %v269_v53 }
  0x46   : > { %514 = vrsqrt.f32 %v272_v54  ;;  %vm289_vm2 = vweird.f32 %v272_v54  ;;  %vm279_vm5 = vweird.f32 %v271_v55 }
  0x47   : > { %516 = vrsqrt.f32 %v271_v55 }
  0x4c   : > { %v515_v56 = vpop.eup %514 }
  0x4d   : > { %v284_v57 = vmul.f32 %v515_v56, %v272_v54  ;;  %v517_v58 = vpop.eup %516  ;;  %vm290_vm3 = vweird.f32 %v515_v56 }
  0x4e   : > { %v274_v59 = vmul.f32 %v517_v58, %v271_v55  ;;  %vm291_vm4 = vmor %vm289_vm2, %vm290_vm3  ;;  %vm280_vm6 = vweird.f32 %v517_v58 }
  0x4f   : > { %v285_v60 = vmul.f32 %v515_v56, %v284_v57  ;;  %vm281_vm7 = vmor %vm279_vm5, %vm280_vm6 }
  0x50   : > { %v275_v61 = vmul.f32 %v517_v58, %v274_v59 }
  0x51   : > { %v286_v62 = vmul.f32 0.5, %v285_v60 }
  0x52   : > { %v276_v63 = vmul.f32 0.5, %v275_v61 }
  0x53   : > { %v287_v0 = vsub.f32 1.5, %v286_v62 }
  0x54   : > { %v277_v1 = vsub.f32 1.5, %v276_v63 }
  0x55   : > { %v288_v2 = vmul.f32 %v515_v56, %v287_v0 }
  0x56   : > { %v278_v5 = vmul.f32 %v517_v58, %v277_v1 }
  0x57   : > { %v292_v6 = vsel %vm291_vm4, %v515_v56, %v288_v2 }
  0x58   : > { %v301_v10 = vrot.slane %v292_v6, 4  ;;  %v282_v11 = vsel %vm281_vm7, %v517_v58, %v278_v5 }
  0x5a   : > { %v302_v15 = vsel %vm218_vm0, %v282_v11, %v301_v10 }
  0x5b   : > { %v304_v16 = vmul.f32 %v302_v15, %v298_v14 }
  0x94   : > { %v308_v12 = vpop.permute.xlu0 %307 }
  0x95   : > { %v312_v17 = vperm.slane %v308_v12, %v311_v13 }
  0x97   : > { %v314_v19 = vmul.f32 %v312_v17, %v304_v16 }
  0x9c   : > { %v318_v18 = vpop.permute.xlu0 %317 }
  0x9d   : > { %v322_v20 = vperm.slane %v318_v18, %v311_v13 }
  0x9f   : > { %v324_v21 = vadd.f32 %v322_v20, %v314_v19 }
  0xa1   : > { %325 = vst [vmem:[%s206_s6] sm:$0xff] %v324_v21 }
  0xa2   : > { %575 = shalt.err (!%p572_p13)
}
  0xa3   : > { %448 = dma.vmem_to_hbm [thread:$0]  (%p706_p9), %s343_s7, 128, %s345_s8, %s327_s9  }
  0xa4 PF: > { %s356_s11 = sand.u32 1, %s610_s12   ;;  %p455_p0 = pnand %p432_p12, %p713_p11 }
  0xa5   : > { %s357_s28 = scalar_lea.sflag [#allocation4], %s356_s11 }
  0xa6   : > { %p456_p1 = pneg %p455_p0 }
  0xa8   : > { %605 = dma.done.wait (%p456_p1), %s357_s28, 128  }
  0xa9   : > { %607 = vsyncadd (%p456_p1), %s357_s28, 4294967168  ;;  %s19_s17 = sadd.s32 1, %s630_s17   ;;  %s805_s12 = smov %s614_s13 }
  0xaa   : > { %p16_p2 = scmp.ge.s32.totalorder %s19_s17, 4   ;;  %s806_s13 = smov %s618_s14 }
  0xab   : > { %s807_s14 = smov %s711_s26  ;;  %s808_s15 = smov %s626_s16 }
  0xac   : > { %s809_s16 = smov %s811_s20  ;;  %18 = sbr.rel (!%p16_p2) target bundleno = 6 (0x6), region = 77 }
  0xb1   :  { %363 = vsyncpa [#allocation3], 1 }
  0xb2   :  { %365 = vsyncpa [#allocation3 + $0x1], 1 }
  0xb3   :  { %366 = vsyncpa [#allocation4], 1 }
  0xb4   :  { %368 = vsyncpa [#allocation4 + $0x1], 1 }

</bundles_post_ra>
